<compile_context>
chip_gen: v5e
topology: v5e:2x2
jax: 0.10.0
libtpu: 0.0.40
codegen_flags: <defaults>
</compile_context>

<pallas_src>
import functools

import jax
import jax.numpy as jnp
from jax.experimental import pallas as pl
from jax.experimental.pallas import tpu as pltpu


# --------------------------------------------------------------------------- kernel

def _span_concat_kernel(a_ref, b_ref, c_ref, rep_ref, out_ref, *, chunk):
    # a_ref   : [1, TI, O]      start@W1 + bias      (this batch, i-tile)
    # b_ref   : [1, 1, TJ*O]    end@W2, lane-flat    (this batch, j-tile)
    # c_ref   : [TI, TJ*O]      width-emb projection, lane-flat (i,j tile; batch-invariant)
    # rep_ref : [O, TJ*O]       constant 0/1 replication matrix (rep[o, t*O+o'] = (o == o'))
    # out_ref : [1, TI, TJ*O]
    ti = a_ref.shape[1]
    n_chunks = ti // chunk

    b = b_ref[0]           # [1, TJ*O] -- broadcasts over rows
    rep = rep_ref[...]     # [O, TJ*O]

    # Chunk over TI so the MXU lane-replication temporary stays a few vregs deep
    # instead of materializing a full [TI, TJ*O] buffer, and stores can stream.
    for cidx in range(n_chunks):
        lo = cidx * chunk
        hi = lo + chunk
        a_c = a_ref[0, lo:hi, :]                                        # [CH, O]
        a_rep = jnp.dot(a_c, rep, preferred_element_type=jnp.float32)   # [CH, TJ*O]
        out = a_rep + b + c_ref[lo:hi, :]
        out_ref[0, lo:hi, :] = out.astype(out_ref.dtype)


# --------------------------------------------------------------------------- helpers

def _vmem_budget():
    """Per-generation (vmem_limit_bytes, max_tile_elems-f32) budgets."""
    try:
        phys = int(pltpu.get_tpu_info().vmem_capacity_bytes)
    except Exception:
        phys = 64 * 1024 * 1024  # conservative (v7x-sized) fallback
    if phys >= 128 * 1024 * 1024:          # v5e / v6e
        return 96 * 1024 * 1024, (8 * 1024 * 1024) // 4
    vmem_limit = min(48 * 1024 * 1024, int(phys * 3 // 4))
    return vmem_limit, (4 * 1024 * 1024) // 4


def _divisors_desc(n):
    return [d for d in range(n, 0, -1) if n % d == 0]


def _choose_tiles(S, O, *, max_tile_elems, max_lanes=2048):
    """Pick (TI, TJ) for the output tile [TI, TJ*O].

    Constraints:
      * TJ divides S; TJ*O multiple of 128 (lane-dense), or TJ == S.
      * TI divides S; TI multiple of 8, or TI == S.
    Preference (per perf review): cap TJ*O at ~max_lanes lanes (keeps the
    replication matrix small), then give the remaining element budget to TI.
    """
    # --- TJ: smallest lane-dense footprint within the lane cap ----------------
    tj_cands = [d for d in _divisors_desc(S) if (d * O) % 128 == 0]
    if tj_cands:
        within = [d for d in tj_cands if d * O <= max_lanes]
        tj = max(within) if within else min(tj_cands)
    else:
        # No divisor makes TJ*O a multiple of 128: fall back to the full extent
        # (valid BlockSpec; stores may be lane-masked).
        tj = S
    # --- TI: largest sublane-valid divisor within the element budget ----------
    ti_cands = [d for d in _divisors_desc(S) if (d % 8 == 0) or (d == S)]
    within = [d for d in ti_cands if d * tj * O <= max_tile_elems]
    ti = max(within) if within else min(ti_cands)
    return ti, tj


def _choose_chunk(ti):
    """8-32 row slices for the in-kernel replication matmul."""
    for c in (32, 16, 8):
        if ti % c == 0:
            return c
    return ti  # ti not a multiple of 8 (only when ti == S and S % 8 != 0)


def build_c_flat(width_emb_table, w3, S, num_width_embeddings):
    """Batch-invariant width-projection plane, lane-flattened to [S, S*O].

    For fixed inference weights, call this once and pass the result to
    span_concat_encoder(..., c_flat=...) to avoid re-materializing it per call.
    """
    hi = jax.lax.Precision.HIGHEST
    width_proj = jnp.dot(width_emb_table, w3, precision=hi)          # [NW, O]
    O = width_proj.shape[1]
    r = jnp.arange(S)
    width_idx = jnp.abs(r[None, :] - r[:, None])                     # [S, S] = |i - j|
    # torch nn.Embedding would raise on out-of-range widths; clamp explicitly.
    width_idx = jnp.clip(width_idx, 0, num_width_embeddings - 1)
    C = width_proj[width_idx]                                        # [S, S, O]
    return C.reshape(S, S * O)


# --------------------------------------------------------------------------- wrapper

def span_concat_encoder(start, end, width_emb_table, W_weight, W_bias,
                        *, num_width_embeddings, bucket_widths=False,
                        tile_i=None, tile_j=None, out_dtype=None,
                        c_flat=None, interpret=False):
    """start, end: [B, S, D] float32. W_weight: [2D+Wd, O]. W_bias: [O]."""
    B, S, D = start.shape
    NW, Wd = width_emb_table.shape
    O = W_weight.shape[1]
    assert W_weight.shape[0] == 2 * D + Wd
    assert NW == num_width_embeddings
    if bucket_widths:
        # TODO(synk): bucket_widths=True path (util.bucket_values) not implemented.
        raise NotImplementedError("bucket_widths=True is not implemented")
    out_dtype = start.dtype if out_dtype is None else out_dtype

    # ---- hoisted projections (plain XLA on small operands, fp32 parity) ------
    hi = jax.lax.Precision.HIGHEST
    w1 = W_weight[:D, :]                                   # acts on the "start" part
    w2 = W_weight[D:2 * D, :]                              # acts on the "end" part
    w3 = W_weight[2 * D:, :]                               # acts on the width-emb part

    A = jnp.dot(start, w1, precision=hi) + W_bias          # [B, S, O]  (bias folded once)
    Bm = jnp.dot(end, w2, precision=hi)                    # [B, S, O]
    if c_flat is None:
        # TODO(synk): for very small batch, synthesizing the C tile in-kernel from
        # the tiny [NW, O] width_proj table would remove this HBM read entirely.
        c_flat = build_c_flat(width_emb_table, w3, S, num_width_embeddings)
    assert c_flat.shape == (S, S * O)

    # Lane-dense presentation: fold O into the last dim.
    B3 = Bm.reshape(B, 1, S * O)                           # [B, 1, S*O]

    # ---- per-generation tiling / VMEM budget ----------------------------------
    vmem_limit, max_tile_elems = _vmem_budget()
    if tile_i is None or tile_j is None:
        TI, TJ = _choose_tiles(S, O, max_tile_elems=max_tile_elems)
    else:
        TI, TJ = tile_i, tile_j
    assert S % TI == 0 and S % TJ == 0
    assert (TI % 8 == 0) or (TI == S)
    assert ((TJ * O) % 128 == 0) or (TJ == S)
    NI, NJ = S // TI, S // TJ
    chunk = _choose_chunk(TI)
    assert TI % chunk == 0

    # Rough VMEM occupancy check (double-buffered out + C, small A/B/rep, chunked temp).
    tile_bytes = TI * TJ * O * 4
    est = (4 * tile_bytes                       # 2x out tile + 2x C tile
           + 2 * TI * O * 4                     # A
           + 2 * TJ * O * 4                     # Bm slice
           + 2 * O * TJ * O * 4                 # replication matrix
           + 2 * chunk * TJ * O * 4)            # chunked a_rep / add temporaries
    if est > vmem_limit:
        raise ValueError(
            f"tile plan TI={TI}, TJ={TJ} needs ~{est} bytes VMEM > limit {vmem_limit}; "
            f"pass smaller tile_i/tile_j explicitly.")

    # Constant 0/1 replication matrix: a[CH,O] @ rep[O,TJ*O] tiles `a` along lanes.
    rep = jnp.tile(jnp.eye(O, dtype=start.dtype), (1, TJ))   # [O, TJ*O]

    # Batch innermost + "arbitrary": the C tile's block index (i, j) is unchanged
    # across b (fetched once per (i, j) tile), and a 2-TC split (v7x) lands on the
    # parallel i/j axes so per-core C reuse is preserved.
    grid = (NI, NJ, B)

    out_flat = pl.pallas_call(
        functools.partial(_span_concat_kernel, chunk=chunk),
        out_shape=jax.ShapeDtypeStruct((B, S, S * O), out_dtype),
        grid_spec=pltpu.PrefetchScalarGridSpec(
            num_scalar_prefetch=0,
            grid=grid,
            in_specs=[
                pl.BlockSpec((1, TI, O), lambda i, j, b: (b, i, 0)),        # A
                pl.BlockSpec((1, 1, TJ * O), lambda i, j, b: (b, 0, j)),    # Bm (flat)
                pl.BlockSpec((TI, TJ * O), lambda i, j, b: (i, j)),         # C (flat, shared)
                pl.BlockSpec((O, TJ * O), lambda i, j, b: (0, 0)),          # replication matrix
            ],
            out_specs=pl.BlockSpec((1, TI, TJ * O), lambda i, j, b: (b, i, j)),
        ),
        compiler_params=pltpu.CompilerParams(
            dimension_semantics=("parallel", "parallel", "arbitrary"),
            vmem_limit_bytes=vmem_limit,
        ),
        interpret=interpret,
    )(A, B3, c_flat, rep)

    return out_flat.reshape(B, S, S, O)


# --------------------------------------------------------------------------- testing

def _reference(start, end, width_emb_table, W_weight, W_bias, num_width_embeddings):
    """Pure-JAX reference mirroring the torch forward (dropout in eval = identity)."""
    B, S, D = start.shape
    hi = jax.lax.Precision.HIGHEST
    start_emb = jnp.broadcast_to(start[:, :, None, :], (B, S, S, D))
    end_emb = jnp.broadcast_to(end[:, None, :, :], (B, S, S, D))
    r = jnp.arange(S)
    width_matrix = jnp.clip(jnp.abs(r[None, :] - r[:, None]), 0, num_width_embeddings - 1)
    wemb = width_emb_table[width_matrix]                   # [S, S, Wd]
    wemb = jnp.broadcast_to(wemb[None], (B, S, S, wemb.shape[-1]))
    span = jnp.concatenate([start_emb, end_emb, wemb], axis=-1)   # 'x,y' + width emb
    return jnp.matmul(span, W_weight, precision=hi) + W_bias


def _run_case(B, S, D, O, NW, Wd, seed, tile_i=None, tile_j=None):
    key = jax.random.PRNGKey(seed)
    k1, k2, k3, k4, k5 = jax.random.split(key, 5)
    combined_dim = 2 * D + Wd

    start = jax.random.normal(k1, (B, S, D), dtype=jnp.float32)
    end = jax.random.normal(k2, (B, S, D), dtype=jnp.float32)
    width_emb_table = jax.random.normal(k3, (NW, Wd), dtype=jnp.float32) * 0.1
    W_weight = jax.random.normal(k4, (combined_dim, O), dtype=jnp.float32) * 0.05
    W_bias = jax.random.normal(k5, (O,), dtype=jnp.float32) * 0.01

    out = span_concat_encoder(start, end, width_emb_table, W_weight, W_bias,
                              num_width_embeddings=NW, tile_i=tile_i, tile_j=tile_j)
    out = jax.block_until_ready(out)

    ref = _reference(start, end, width_emb_table, W_weight, W_bias, NW)
    assert out.shape == (B, S, S, O), out.shape
    err = float(jnp.abs(out - ref).max())
    assert jnp.allclose(out, ref, atol=1e-4, rtol=1e-4), err
    return err


if __name__ == "__main__":
    # Case 1: small deterministic configuration (matches the module defaults' spirit).
    _run_case(B=2, S=8, D=32, O=16, NW=10, Wd=8, seed=0)

    # Case 2: exercise the tiled (i, j, batch) grid explicitly (grid = (2, 2, 2)).
    _run_case(B=2, S=16, D=32, O=16, NW=20, Wd=8, seed=0, tile_i=8, tile_j=8)

    # Case 3: auto-tiled, exercises the in-kernel multi-chunk replication path
    # (TI = 64 -> two 32-row chunks per grid step).
    _run_case(B=2, S=64, D=32, O=16, NW=70, Wd=8, seed=1)

    print("KERNEL_OK")
</pallas_src>

<mosaic_0001>
module attributes {stable_mosaic.version = 11 : i64} {
  func.func @_span_concat_kernel(%arg0: i32, %arg1: i32, %arg2: i32, %arg3: memref<1x8x16xf32, #tpu.memory_space<vmem>>, %arg4: memref<1x1x128xf32, #tpu.memory_space<vmem>>, %arg5: memref<8x128xf32, #tpu.memory_space<vmem>>, %arg6: memref<16x128xf32, #tpu.memory_space<vmem>>, %arg7: memref<1x8x128xf32, #tpu.memory_space<vmem>>) attributes {dimension_semantics = [#tpu.dimension_semantics<parallel>, #tpu.dimension_semantics<parallel>, #tpu.dimension_semantics<arbitrary>], iteration_bounds = array<i64: 1, 1, 2>, scalar_prefetch = 0 : i64, scratch_operands = 0 : i64, tpu.core_type = #tpu.core_type<tc>, window_params = [{transform_indices = @transform_0, window_bounds = array<i64: 1, 8, 16>}, {transform_indices = @transform_1, window_bounds = array<i64: 1, 1, 128>}, {transform_indices = @transform_2, window_bounds = array<i64: 8, 128>}, {pipeline_mode = #tpu.pipeline_mode<synchronous>, transform_indices = @transform_3, window_bounds = array<i64: 16, 128>}, {transform_indices = @transform_4, window_bounds = array<i64: 1, 8, 128>}]} {
    %c0 = arith.constant 0 : index
    %c0_0 = arith.constant 0 : index
    %c0_1 = arith.constant 0 : index
    %0 = vector.load %arg4[%c0, %c0_0, %c0_1] : memref<1x1x128xf32, #tpu.memory_space<vmem>>, vector<1x1x128xf32>
    %1 = vector.shape_cast %0 : vector<1x1x128xf32> to vector<1x128xf32>
    %c0_2 = arith.constant 0 : index
    %c0_3 = arith.constant 0 : index
    %2 = vector.load %arg6[%c0_2, %c0_3] : memref<16x128xf32, #tpu.memory_space<vmem>>, vector<16x128xf32>
    %c0_4 = arith.constant 0 : index
    %c0_5 = arith.constant 0 : index
    %c0_6 = arith.constant 0 : index
    %3 = vector.load %arg3[%c0_4, %c0_5, %c0_6] : memref<1x8x16xf32, #tpu.memory_space<vmem>>, vector<1x8x16xf32>
    %4 = vector.shape_cast %3 : vector<1x8x16xf32> to vector<8x16xf32>
    %cst = arith.constant dense<0.000000e+00> : vector<8x128xf32>
    %5 = tpu.matmul %4, %2, %cst {dimension_numbers = #tpu.dot_dimension_numbers<[1], [0], [0], [1], [0, 0, 1, 1], [], []>} : vector<8x16xf32>, vector<16x128xf32>, vector<8x128xf32> -> vector<8x128xf32>
    %6 = vector.broadcast %1 : vector<1x128xf32> to vector<8x128xf32>
    %7 = arith.addf %5, %6 : vector<8x128xf32>
    %c0_7 = arith.constant 0 : index
    %c0_8 = arith.constant 0 : index
    %8 = vector.load %arg5[%c0_7, %c0_8] : memref<8x128xf32, #tpu.memory_space<vmem>>, vector<8x128xf32>
    %9 = arith.addf %7, %8 : vector<8x128xf32>
    %c0_9 = arith.constant 0 : index
    %c0_10 = arith.constant 0 : index
    %c0_11 = arith.constant 0 : index
    %10 = vector.load %arg7[%c0_9, %c0_10, %c0_11] : memref<1x8x128xf32, #tpu.memory_space<vmem>>, vector<1x8x128xf32>
    %11 = vector.shape_cast %10 : vector<1x8x128xf32> to vector<8x128xf32>
    %12 = vector.shape_cast %9 : vector<8x128xf32> to vector<1x8x128xf32>
    tpu.vector_store %arg7[%c0_9, %c0_10, %c0_11], %12 {strides = array<i32>} : memref<1x8x128xf32, #tpu.memory_space<vmem>>, vector<1x8x128xf32>,
    return
  }
  func.func @transform_0(%arg0: i32, %arg1: i32, %arg2: i32) -> (i32, i32, i32) {
    %c0_i32 = arith.constant 0 : i32
    %c0_i32_0 = arith.constant 0 : i32
    return %arg2, %arg0, %c0_i32 : i32, i32, i32
  }
  func.func @transform_1(%arg0: i32, %arg1: i32, %arg2: i32) -> (i32, i32, i32) {
    %c0_i32 = arith.constant 0 : i32
    %c0_i32_0 = arith.constant 0 : i32
    return %arg2, %c0_i32, %arg1 : i32, i32, i32
  }
  func.func @transform_2(%arg0: i32, %arg1: i32, %arg2: i32) -> (i32, i32) {
    %c0_i32 = arith.constant 0 : i32
    return %arg0, %arg1 : i32, i32
  }
  func.func @transform_3(%arg0: i32, %arg1: i32, %arg2: i32) -> (i32, i32) {
    %c0_i32 = arith.constant 0 : i32
    %c0_i32_0 = arith.constant 0 : i32
    %c0_i32_1 = arith.constant 0 : i32
    return %c0_i32, %c0_i32_0 : i32, i32
  }
  func.func @transform_4(%arg0: i32, %arg1: i32, %arg2: i32) -> (i32, i32, i32) {
    %c0_i32 = arith.constant 0 : i32
    return %arg2, %arg0, %arg1 : i32, i32, i32
  }
}

</mosaic_0001>

<bundles_post_ra>
// kernel: tpu_custom_call.1
= control target key start
LH: loop header
LB: loop body
LE: loop exit
PB: predicated region body
PF: predicated region fallthrough
CT: control target
= control target key end

     0   :  { %s1017_s0 = inlined_call_operand.hbm [shape: f32[2,8,16], index: 0, kind: input, shape index: {}]   ;;  %s1018_s1 = inlined_call_operand.hbm [shape: f32[2,1,128], index: 1, kind: input, shape index: {}]   ;;  %s1019_s2 = inlined_call_operand.hbm [shape: f32[8,128], index: 2, kind: input, shape index: {}]   ;;  %s1020_s3 = inlined_call_operand.hbm [shape: f32[16,128], index: 3, kind: input, shape index: {}]   ;;  %s1021_s4 = inlined_call_operand.hbm [shape: f32[2,8,128], index: 4, kind: output, shape index: {}]  }
   0x1   :  { %1024 = sst [smem:[#allocation19_spill]] %s1019_s2 }
   0x2   :  { %1025 = sst [smem:[#allocation20_spill]] %s1020_s3 }
   0x3   :  { %9 = vsyncpa [#allocation3], 0 }
   0x4   :  { %11 = vsyncpa [#allocation3 + $0x1], 0 }
   0x5   :  { %12 = vsyncpa [#allocation6], 0 }
   0x6   :  { %14 = vsyncpa [#allocation6 + $0x1], 0 }
   0x7   :  { %15 = vsyncpa [#allocation9], 0 }
   0x8   :  { %16 = vsyncpa [#allocation4], 0 }
   0x9   :  { %18 = vsyncpa [#allocation4 + $0x1], 0  ;;  %s852_s15 = smov 0   ;;  %s854_s16 = smov 0  }
   0xa   :  { %s856_s17 = smov 0   ;;  %s858_s18 = smov 0  }
   0xb   :  { %s860_s19 = smov 0   ;;  %s862_s20 = smov 0  }
   0xc LB: > { %1026 = sst [smem:[#allocation16_spill]] %s809_s17  ;;  %s883_s21 = sadd.s32 4294967295, %s821_s20   ;;  %s821_s20 = sphi %s862_s20, %s24_s20   ;;  %s817_s19 = sphi %s860_s19, %s1042_s19   ;;  %s813_s18 = sphi %s858_s18, %s1041_s18   ;;  %s809_s17 = sphi %s856_s17, %s1037_s17   ;;  %s805_s16 = sphi %s854_s16, %s1040_s16   ;;  %s801_s15 = sphi %s852_s15, %s1039_s15  }
   0xd   : > { %s499_s22 = sadd.s32 4294967294, %s821_s20   ;;  %p65_p0 = scmp.ne.s32.totalorder %s805_s16, %s801_s15 }
   0xe   : > { %p66_p1 = scmp.eq.s32.totalorder %s883_s21, 0  ;;  %p170_p2 = scmp.eq.s32.totalorder %s883_s21, 1 }
   0xf   : > { %p176_p3 = scmp.eq.s32.totalorder %s499_s22, 1  ;;  %p500_p5 = scmp.ge.s32.totalorder %s821_s20, 1 }
  0x10   : > { %p892_p4 = por %p66_p1, %p65_p0  ;;  %p183_p7 = scmp.lt.s32.totalorder %s821_s20, 3 }
  0x11   : > { %p897_p6 = por %p176_p3, %p65_p0  ;;  %s1029_s2 = sld [smem:[#allocation19_spill]] }
  0x12   : > { %p905_p8 = pnand %p500_p5, %p183_p7  ;;  %p503_p9 = scmp.ge.s32.totalorder %s821_s20, 2 }
  0x13   : > { %s823_s29 = smov [#allocation7]   ;;  %s1031_s3 = sld [smem:[#allocation20_spill]] }
  0x14   : > { %p530_p10 = pneg %p905_p8  ;;  %s200_s30 = sshll.u32 %s823_s29, 4  ;;  %s201_s30 = int_to_ptr.vmem [resolvable:$true] %s200_s30 }
  0x15   : > { %s824_s8 = smov [#allocation8]   ;;  %s825_s10 = smov 128  }
  0x16   : > { %p531_p11 = pnand %p530_p10, %p66_p1  ;;  %s211_s9 = sshll.u32 %s824_s8, 4  ;;  %s212_s9 = int_to_ptr.vmem [resolvable:$true] %s211_s9 }
  0x17   : > { %s198_s27 = sshll.u32 %s1029_s2, 4  ;;  %s826_s11 = smov 8   ;;  %s199_s27 = int_to_ptr.hbm [resolvable:$true] %s198_s27 }
  0x18   : > { %533 = dma.hbm_to_vmem [thread:$0]  (!%p531_p11), %s199_s27, 128, %s201_s30, [#allocation6]  }
  0x19   : > { %s209_s7 = sshll.u32 %s1031_s3, 4  ;;  %s36_s12 = sadd.s32 1, %s817_s19  ;;  %s210_s7 = int_to_ptr.hbm [resolvable:$true] %s209_s7 }
  0x1a   : > { %536 = dma.hbm_to_vmem [thread:$0]  (!%p531_p11), %s210_s7, 256, %s212_s9, [#allocation9], %s825_s10, %s825_s10, %s826_s11  }
  0x1b   : > { %s52_s13 = sadd.s32 1, %s809_s17  ;;  %p37_p12 = scmp.ge.s32.totalorder %s36_s12, 2 }
  0x1c   : > { %p59_p13 = scmp.ne.s32.totalorder %s809_s17, %s805_s16  ;;  %p60_p0 = scmp.eq.s32.totalorder %s821_s20, 0 }
  0x1d   : > { %p550_p3 = scmp.lt.s32.totalorder %s821_s20, 2  ;;  %s1044_s12 = smov (%p37_p12, %s36_s12), 0 }
  0x1e   : > { %1032 = sst [smem:[#allocation17_spill]] %s1044_s12  ;;  %p925_p5 = por %p60_p0, %p59_p13 }
  0x1f   : > { %p931_p7 = por %p170_p2, %p59_p13  ;;  %s47_s25 = ssub.s32 %s817_s19, %s1044_s12 }
  0x20   : > { %s225_s26 = sand.u32 1, %s809_s17   ;;  %p50_p10 = scmp.eq.s32.totalorder %s47_s25, 0 }
  0x21   : > { %s504_s27 = sshll.u32 %s225_s26, 3  ;;  %s505_s29 = sshll.u32 %s817_s19, 3 }
  0x22   : > { %s940_s30 = scalar_select %p50_p10, %s809_s17, %s52_s13  }
  0x23   : > { %s234_s7 = scalar_lea.hbm %s1017_s0, %s505_s29  ;;  %s229_s9 = scalar_lea.vmem [#allocation2], %s504_s27 }
  0x24   : > { %1035 = sst [smem:[#allocation18_spill]] %s940_s30  ;;  %s236_s8 = sshll.u32 %s234_s7, 4  ;;  %s237_s8 = int_to_ptr.hbm [resolvable:$true] %s236_s8 }
  0x25   : > { %s238_s10 = sshll.u32 %s229_s9, 4  ;;  %p538_p2 = pnand %p550_p3, %p925_p5  ;;  %s239_s10 = int_to_ptr.vmem [resolvable:$true] %s238_s10 }
  0x26   : > { %s245_s11 = sand.u32 1, %s821_s20   ;;  %s252_s25 = scalar_lea.hbm %s1018_s1, %s817_s19 }
  0x27   : > { %s226_s12 = scalar_lea.sflag [#allocation3], %s225_s26  ;;  %s254_s13 = sshll.u32 %s252_s25, 4  ;;  %s255_s13 = int_to_ptr.hbm [resolvable:$true] %s254_s13 }
  0x28   : > { %540 = dma.hbm_to_vmem [thread:$0]  (!%p538_p2), %s237_s8, 128, %s239_s10, %s226_s12  }
  0x29   : > { %s248_s30 = scalar_lea.vmem [#allocation5], %s225_s26  ;;  %s246_s29 = scalar_lea.sflag [#allocation6], %s245_s11 }
  0x2a   : > { %s256_s17 = sshll.u32 %s248_s30, 4  ;;  %265 = sbr.rel (%p905_p8) target bundleno = 192 (0xc0), region = 36  ;;  %s257_s17 = int_to_ptr.vmem [resolvable:$true] %s256_s17 }
  0x2b   : > { %543 = dma.hbm_to_vmem [thread:$0]  (!%p538_p2), %s255_s13, 16, %s257_s17, %s246_s29  }
  0x2c   : > { %s957_s14 = sand.u32 (!%p905_p8), 1, %s805_s16  }
  0x2d   : > { %s507_s2 = sshll.u32 (!%p905_p8), %s957_s14, 3  ;;  %s268_s3 = scalar_lea.sflag (!%p905_p8), [#allocation3], %s957_s14 }
  0x2e   : > { %s271_s27 = scalar_lea.vmem (!%p905_p8), [#allocation2], %s507_s2 }
  0x2f   : > { %780 = dma.done.wait (%p892_p4), %s268_s3, 128  }
  0x30   : > { %782 = vsyncadd (%p892_p4), %s268_s3, 4294967168  ;;  %s277_s17 = sand.u32 1, %s883_s21   ;;  %s280_s12 = scalar_lea.vmem [#allocation5], %s957_s14 }
  0x31   : > { %s278_s28 = scalar_lea.sflag [#allocation6], %s277_s17 }
  0x32   : > { %784 = dma.done.wait (%p892_p4), %s278_s28, 16  }
  0x33   : > { %786 = vsyncadd (%p892_p4), %s278_s28, 4294967280 }
  0x34   : > { %788 = dma.done.wait (%p66_p1), [#allocation6], 128  }
  0x35   : > { %790 = vsyncadd (%p66_p1), [#allocation6], 4294967168 }
  0x36   : > { %792 = dma.done.wait (%p66_p1), [#allocation9], 256  }
  0x37   : > { %794 = vsyncadd (%p66_p1), [#allocation9], 4294967040  ;;  %v322_v0 = vld [vmem:[#allocation8 + $0x8] sm:$0xff]  ;;  %v321_v1 = vld [vmem:[#allocation8] sm:$0xff]  ;;  %vm327_vm0 = vcmask 130048   ;;  %s513_s23 = sshll.u32 %s813_s18, 3 }
  0x38   : > { %345 = vmatpush.msra.mxu0 %v322_v0  ;;  %v323_v2 = vld [vmem:[%s271_s27] sm:$0xff]  ;;  %s367_s5 = scalar_lea.hbm %s1021_s4, %s513_s23  ;;  %v351_v5 = vld [vmem:[#allocation7] sm:$0xff]  ;;  %s319_s21 = scalar_lea.vmem [#allocation10], %s507_s2 }
  0x39   : > { %v606_v3 = vld [vmem:[%s280_s12] ss:$0 sm:$0xff]  ;;  %s369_s6 = sshll.u32 %s319_s21, 4  ;;  %s371_s7 = sshll.u32 %s367_s5, 4  ;;  %s370_s6 = int_to_ptr.vmem [resolvable:$true] %s369_s6  ;;  %s372_s7 = int_to_ptr.hbm [resolvable:$true] %s371_s7 }
  0x3a   : > { %346 = vmatpush.msra.mxu0 %v321_v1  ;;  %s355_s8 = scalar_lea.sflag [#allocation4], %s957_s14  ;;  %s741_s9 = sshra.s32 %s372_s7, 4  ;;  %s742_s9 = int_to_ptr.hbm [resolvable:$true] %s741_s9 }
  0x3b   : > { %511 = vmatmul.msk.f32.vlgmr.msra.gmra.mxu0 %vm327_vm0, %v323_v2  ;;  %s743_s18 = scalar_lea.hbm %s742_s9, 8  ;;  %s747_s25 = scalar_lea.hbm %s1021_s4, 16 }
  0x3c   : > { %p744_p1 = scmp.ne.s32.totalorder %s742_s9, %s743_s18  ;;  %p748_p11 = scmp.lt.s32.totalorder %s742_s9, %s1021_s4 }
  0x3d   : > { %p749_p12 = scmp.lt.s32.totalorder %s747_s25, %s743_s18 }
  0x3e   : > { %p745_p4 = pnand %p744_p1, %p931_p7 }
  0x3f   : > { %p750_p13 = por %p749_p12, %p748_p11 }
  0x40   : > { %p746_p8 = pneg %p745_p4 }
  0x42   : > { %p751_p0 = pnand %p750_p13, %p746_p8 }
  0xb8   : > { %v348_v4 = vpop.f32.mrf.mxu0 }
  0xb9   : > { %v349_v6 = vadd.f32 %v606_v3, %v348_v4 }
  0xbb   : > { %v352_v7 = vadd.f32 %v351_v5, %v349_v6 }
  0xbd   : > { %353 = vst [vmem:[%s319_s21] sm:$0xff] %v352_v7 }
  0xbe   : > { %754 = shalt.err (!%p751_p0)
}
  0xbf   : > { %528 = dma.vmem_to_hbm [thread:$0]  (%p931_p7), %s370_s6, 128, %s372_s7, %s355_s8  }
  0xc0 PF: > { %s383_s14 = sand.u32 1, %s801_s15   ;;  %p545_p3 = pnand %p503_p9, %p897_p6 }
  0xc1   : > { %s384_s2 = scalar_lea.sflag [#allocation4], %s383_s14 }
  0xc2   : > { %p546_p5 = pneg %p545_p3 }
  0xc4   : > { %796 = dma.done.wait (%p546_p5), %s384_s2, 128  }
  0xc5   : > { %798 = vsyncadd (%p546_p5), %s384_s2, 4294967168  ;;  %s24_s20 = sadd.s32 1, %s821_s20   ;;  %s1036_s3 = sld [smem:[#allocation16_spill]] }
  0xc6   : > { %p21_p10 = scmp.ge.s32.totalorder %s24_s20, 4   ;;  %s1037_s17 = sld [smem:[#allocation18_spill]] }
  0xc7   : > { %s1038_s22 = sld [smem:[#allocation17_spill]]  ;;  %s1039_s15 = smov %s805_s16 }
  0xc8   : > { %s1041_s18 = smov %s817_s19 }
  0xc9   :  { %23 = sbr.rel (!%p21_p10) target bundleno = 12 (0xc), region = 103 }
  0xcb   : > { %s1040_s16 = smov %s1036_s3 }
  0xcd   : > { %s1042_s19 = smov %s1038_s22 }
  0xce   :  { %390 = vsyncpa [#allocation3], 1 }
  0xcf   :  { %392 = vsyncpa [#allocation3 + $0x1], 1 }
  0xd0   :  { %393 = vsyncpa [#allocation6], 1 }
  0xd1   :  { %395 = vsyncpa [#allocation6 + $0x1], 1 }
  0xd2   :  { %396 = vsyncpa [#allocation9], 1 }
  0xd3   :  { %397 = vsyncpa [#allocation4], 1 }
  0xd4   :  { %399 = vsyncpa [#allocation4 + $0x1], 1 }

</bundles_post_ra>
